<compile_context>
chip_gen: v7x
topology: tpu7x:2x2x1
jax: 0.10.0
libtpu: 0.0.40
codegen_flags: <defaults>
</compile_context>

<pallas_src>
import jax
import jax.numpy as jnp
from jax.experimental import pallas as pl
from jax.experimental.pallas import tpu as pltpu


def _scaling_kernel(x_ref, shift_ref, inv_scale_ref, o_ref):
    # x_ref / o_ref: (kR, L);  shift_ref / inv_scale_ref: (1, L)
    x = x_ref[...]
    shift = shift_ref[...]
    inv_scale = inv_scale_ref[...]
    o_ref[...] = (x - shift) * inv_scale


def scaling_layer(x, shift, scale, *, target_block_bytes=4 * 1024 * 1024):
    """x: (B, C, M, T); shift/scale: (M,) per-mel-bin buffers."""
    B, C, M, T = x.shape
    R = B * C
    L = M * T

    # Exact reciprocal in f32 (only M elements, done once in the wrapper), then
    # pre-broadcast both per-bin vectors to the flat (M*T,) lane layout so the
    # kernel sees lane-dense 2-D tiles.
    inv_scale = (1.0 / scale.astype(jnp.float32)).astype(x.dtype)
    shift_flat = jnp.broadcast_to(
        shift.astype(x.dtype).reshape(M, 1), (M, T)).reshape(1, L)
    inv_scale_flat = jnp.broadcast_to(
        inv_scale.reshape(M, 1), (M, T)).reshape(1, L)

    x2d = x.reshape(R, L)

    # Largest lane-dense block whose double buffers (in + out, 2-deep) stay a
    # few MiB: ~4 * block_bytes of pipelined VMEM, safe on v5e/v6e/v7x.
    row_bytes = L * x.dtype.itemsize
    k_rows = max(1, target_block_bytes // row_bytes)
    if k_rows >= R:
        k_rows = R                                # whole row axis in one block
    else:
        k_rows = max(8, (k_rows // 8) * 8)        # keep (8,128)-friendly blocks
        k_rows = min(k_rows, R)
    grid = (pl.cdiv(R, k_rows),)

    out2d = pl.pallas_call(
        _scaling_kernel,
        out_shape=jax.ShapeDtypeStruct((R, L), x.dtype),
        grid_spec=pltpu.PrefetchScalarGridSpec(
            num_scalar_prefetch=0,
            grid=grid,
            in_specs=[
                pl.BlockSpec((k_rows, L), lambda i: (i, 0)),
                pl.BlockSpec((1, L), lambda i: (0, 0)),
                pl.BlockSpec((1, L), lambda i: (0, 0)),
            ],
            out_specs=pl.BlockSpec((k_rows, L), lambda i: (i, 0)),
        ),
        compiler_params=pltpu.CompilerParams(
            dimension_semantics=("parallel",),
        ),
    )(x2d, shift_flat, inv_scale_flat)

    return out2d.reshape(B, C, M, T)


if __name__ == "__main__":
    key = jax.random.PRNGKey(0)
    k_means, k_stds, k_x = jax.random.split(key, 3)

    B, C, M, T = 2, 1, 16, 16  # small melspec-like NCHW input

    # Synthetic deterministic stand-ins for the per-mel-bin means/stds normally
    # loaded from 'train_means_stds_melspec_10s_22050hz.txt'.
    means = jax.random.uniform(k_means, (M,), dtype=jnp.float32)            # in [0, 1)
    stds = jax.random.uniform(k_stds, (M,), dtype=jnp.float32) * 0.5 + 0.5  # positive

    # Same transform as ScalingLayer.__init__
    shift = 2.0 * means - 1.0
    scale = 2.0 * stds

    x = jax.random.normal(k_x, (B, C, M, T), dtype=jnp.float32)

    out = scaling_layer(x, shift, scale)
    out = jax.block_until_ready(out)

    # Reference check (plain JAX broadcasting, identical to the PyTorch forward).
    # Tolerance accounts for multiply-by-exact-reciprocal vs divide (~1-2 ulp).
    ref = (x - shift[None, None, :, None]) / scale[None, None, :, None]
    assert out.shape == (B, C, M, T)
    assert jnp.allclose(out, ref, rtol=1e-5, atol=1e-6), float(
        jnp.max(jnp.abs(out - ref)))

    print("KERNEL_OK")
</pallas_src>

<mosaic_0001>
module attributes {stable_mosaic.version = 11 : i64} {
  func.func @_scaling_kernel(%arg0: i32, %arg1: memref<2x256xf32, #tpu.memory_space<vmem>>, %arg2: memref<1x256xf32, #tpu.memory_space<vmem>>, %arg3: memref<1x256xf32, #tpu.memory_space<vmem>>, %arg4: memref<2x256xf32, #tpu.memory_space<vmem>>) attributes {dimension_semantics = [#tpu.dimension_semantics<parallel>], iteration_bounds = array<i64: 1>, scalar_prefetch = 0 : i64, scratch_operands = 0 : i64, tpu.core_type = #tpu.core_type<tc>, window_params = [{transform_indices = @transform_0, window_bounds = array<i64: 2, 256>}, {pipeline_mode = #tpu.pipeline_mode<synchronous>, transform_indices = @transform_1, window_bounds = array<i64: 1, 256>}, {pipeline_mode = #tpu.pipeline_mode<synchronous>, transform_indices = @transform_2, window_bounds = array<i64: 1, 256>}, {transform_indices = @transform_3, window_bounds = array<i64: 2, 256>}]} {
    %c0 = arith.constant 0 : index
    %c0_0 = arith.constant 0 : index
    %0 = vector.load %arg1[%c0, %c0_0] : memref<2x256xf32, #tpu.memory_space<vmem>>, vector<2x256xf32>
    %c0_1 = arith.constant 0 : index
    %c0_2 = arith.constant 0 : index
    %1 = vector.load %arg2[%c0_1, %c0_2] : memref<1x256xf32, #tpu.memory_space<vmem>>, vector<1x256xf32>
    %c0_3 = arith.constant 0 : index
    %c0_4 = arith.constant 0 : index
    %2 = vector.load %arg3[%c0_3, %c0_4] : memref<1x256xf32, #tpu.memory_space<vmem>>, vector<1x256xf32>
    %3 = vector.broadcast %1 : vector<1x256xf32> to vector<2x256xf32>
    %4 = arith.subf %0, %3 : vector<2x256xf32>
    %5 = vector.broadcast %2 : vector<1x256xf32> to vector<2x256xf32>
    %6 = arith.mulf %4, %5 : vector<2x256xf32>
    %c0_5 = arith.constant 0 : index
    %c0_6 = arith.constant 0 : index
    %7 = vector.load %arg4[%c0_5, %c0_6] : memref<2x256xf32, #tpu.memory_space<vmem>>, vector<2x256xf32>
    tpu.vector_store %arg4[%c0_5, %c0_6], %6 {strides = array<i32>} : memref<2x256xf32, #tpu.memory_space<vmem>>, vector<2x256xf32>,
    return
  }
  func.func @transform_0(%arg0: i32) -> (i32, i32) {
    %c0_i32 = arith.constant 0 : i32
    %c0_i32_0 = arith.constant 0 : i32
    return %arg0, %c0_i32 : i32, i32
  }
  func.func @transform_1(%arg0: i32) -> (i32, i32) {
    %c0_i32 = arith.constant 0 : i32
    %c0_i32_0 = arith.constant 0 : i32
    %c0_i32_1 = arith.constant 0 : i32
    return %c0_i32, %c0_i32_0 : i32, i32
  }
  func.func @transform_2(%arg0: i32) -> (i32, i32) {
    %c0_i32 = arith.constant 0 : i32
    %c0_i32_0 = arith.constant 0 : i32
    %c0_i32_1 = arith.constant 0 : i32
    return %c0_i32, %c0_i32_0 : i32, i32
  }
  func.func @transform_3(%arg0: i32) -> (i32, i32) {
    %c0_i32 = arith.constant 0 : i32
    %c0_i32_0 = arith.constant 0 : i32
    return %arg0, %c0_i32 : i32, i32
  }
}

</mosaic_0001>

<bundles_post_ra>
// kernel: tpu_custom_call.1
= control target key start
LH: loop header
LB: loop body
LE: loop exit
PB: predicated region body
PF: predicated region fallthrough
CT: control target
= control target key end

     0   :  { %8 = vsyncpa [#allocation3], 0  ;;  %s188_s0 = inlined_call_operand.hbm [shape: f32[2,256], index: 0, kind: input, shape index: {}]   ;;  %s189_s1 = inlined_call_operand.vmem [shape: f32[1,256], index: 1, kind: input, shape index: {}]   ;;  %s190_s2 = inlined_call_operand.vmem [shape: f32[1,256], index: 2, kind: input, shape index: {}]   ;;  %s191_s3 = inlined_call_operand.hbm [shape: f32[2,256], index: 3, kind: output, shape index: {}]  }
   0x1   :  { %9 = vsyncpa [#allocation4], 0  ;;  %s135_s12 = smov [#allocation2]   ;;  %s87_s16 = scalar_lea.hbm %s188_s0, 64 }
   0x2   :  { %s16_s13 = sshll.u32 %s135_s12, 4  ;;  %p88_p0 = scmp.ne.s32.totalorder %s188_s0, %s87_s16  ;;  %s17_s13 = int_to_ptr.vmem [resolvable:$true] %s16_s13 }
   0x3   :  { %p91_p1 = scmp.lt.u32.totalorder %s87_s16, %s188_s0 }
   0x5   :  { %p93_p2 = pnand %p91_p1, %p88_p0 }
   0x7   :  { %96 = shalt.err (!%p93_p2)
}
   0x8   :  { %s97_s21 = scalar_lea.vmem %s17_s13, 64  ;;  %p102_p4 = scmp.lt.s32.totalorder %s17_s13, %s17_s13 }
   0x9   :  { %p98_p3 = scmp.ne.s32.totalorder %s17_s13, %s97_s21  ;;  %p103_p5 = scmp.lt.s32.totalorder %s97_s21, %s97_s21 }
   0xb   :  { %p104_p6 = por %p103_p5, %p102_p4 }
   0xd   :  { %p105_p7 = pnand %p104_p6, %p98_p3 }
   0xf   :  { %108 = shalt.err (!%p105_p7)
}
  0x10   :  { %19 = dma.hbm_to_vmem [thread:$0]  %s188_s0, 64, %s17_s13, [#allocation3]  }
  0x11   :  { %131 = dma.done.wait [#allocation3], 64  }
  0x12   :  { %132 = vsyncadd [#allocation3], 4294967232  ;;  %v31_v0 = vlaneseq  ;;  %v136_v1 = vmov 1983009808   ;;  %v28_v7 = vld [vmem:[%s189_s1] sm:$0x3] }
  0x13   :  { %v41_v2 = vunpack.c.l.s4 %v136_v1  ;;  %v29_v8 = vld [vmem:[%s190_s2] sm:$0x3]  ;;  %s137_s0 = smov [#allocation5]  }
  0x14   :  { %v32_v3 = vshrl.u32 %v31_v0, 7  ;;  %v27_v16 = vld [vmem:[#allocation2] sm:$0xf]  ;;  %s75_s28 = sshll.u32 %s137_s0, 4  ;;  %s76_s28 = int_to_ptr.vmem [resolvable:$true] %s75_s28 }
  0x15   :  { %v42_v4 = vunpack.c.0.s8 %v41_v2  ;;  %s109_s1 = scalar_lea.vmem %s76_s28, 64  ;;  %p114_p9 = scmp.lt.s32.totalorder %s76_s28, %s76_s28 }
  0x16   :  { %v33_v5 = vsub.s32 0, %v32_v3  ;;  %v37_v6 = vsub.s32 1, %v32_v3  ;;  %p110_p8 = scmp.ne.s32.totalorder %s76_s28, %s109_s1  ;;  %p115_p10 = scmp.lt.s32.totalorder %s109_s1, %s109_s1 }
  0x17   :  { %v45_v9 = vsub.s32 %v42_v4, %v32_v3 }
  0x18   :  { %v34_v10 = vrot.slane %v28_v7, %v33_v5  ;;  %v38_v11 = vrot.slane %v28_v7, %v37_v6  ;;  %v53_v12 = vrot.slane %v29_v8, %v33_v5  ;;  %v57_v13 = vrot.slane %v29_v8, %v37_v6  ;;  %p116_p11 = por %p115_p10, %p114_p9 }
  0x1a   :  { %v39_v14 = vcombine.low %v34_v10, %v38_v11  ;;  %v58_v15 = vcombine.low %v53_v12, %v57_v13  ;;  %p117_p12 = pnand %p116_p11, %p110_p8 }
  0x1c   :  { %v46_v17 = vrot.slane %v39_v14, %v45_v9  ;;  %v65_v18 = vrot.slane %v58_v15, %v45_v9 }
  0x1e   :  { %v48_v19 = vsub.f32 %v27_v16, %v46_v17 }
  0x20   :  { %v67_v20 = vmul.f32 %v65_v18, %v48_v19 }
  0x22   :  { %68 = vst [vmem:[#allocation5] sm:$0xf] %v67_v20 }
  0x23   :  { %120 = shalt.err (!%p117_p12)
}
  0x24   :  { %s121_s30 = scalar_lea.hbm %s191_s3, 64 }
  0x25   :  { %p122_p13 = scmp.ne.s32.totalorder %s191_s3, %s121_s30  ;;  %p125_p0 = scmp.lt.u32.totalorder %s121_s30, %s191_s3 }
  0x27   :  { %p127_p1 = pnand %p125_p0, %p122_p13 }
  0x29   :  { %130 = shalt.err (!%p127_p1)
}
  0x2a   :  { %78 = dma.vmem_to_hbm [thread:$0]  %s76_s28, 64, %s191_s3, [#allocation4]  }
  0x2b   :  { %133 = dma.done.wait [#allocation4], 64  }
  0x2c   :  { %134 = vsyncadd [#allocation4], 4294967232 }
  0x2d   :  { %82 = vsyncpa [#allocation3], 1 }
  0x2e   :  { %83 = vsyncpa [#allocation4], 1 }

</bundles_post_ra>
